<compile_context>
chip_gen: v6e
topology: v6e:2x2x1
jax: 0.10.0
libtpu: 0.0.40
codegen_flags: <defaults>
</compile_context>

<pallas_src>
import functools

import jax
import jax.numpy as jnp
from jax.experimental import pallas as pl
from jax.experimental.pallas import tpu as pltpu


def _round_up(v, m):
    return (v + m - 1) // m * m


def _activate(x, act):
    if act == "relu":
        return jnp.maximum(x, 0.0)
    return jax.nn.gelu(x)


def _mlp_kernel(*refs, normalize, ln_eps, multi_k, act):
    idx = 0
    x_ref = refs[idx]
    idx += 1
    if normalize:
        g_ref = refs[idx]
        bln_ref = refs[idx + 1]
        idx += 2
    w1_ref, b1_ref, w2_ref, b2_ref, o_ref = refs[idx:idx + 5]
    idx += 5
    scratch = list(refs[idx:])
    xb_ref = scratch.pop(0) if normalize else None
    acc_ref = scratch.pop(0) if multi_k else None

    k = pl.program_id(2)

    if normalize:
        # First k-step for this (i, j) tile: LayerNorm in f32, cache bf16 copy
        # for the MXU so the LN is not recomputed on later k steps.
        @pl.when(k == 0)
        def _():
            x = x_ref[...].astype(jnp.float32)
            mu = jnp.mean(x, axis=-1, keepdims=True)
            var = jnp.mean((x - mu) * (x - mu), axis=-1, keepdims=True)
            xn = (x - mu) * jax.lax.rsqrt(var + ln_eps)
            xn = xn * g_ref[...] + bln_ref[...]
            xb_ref[...] = xn.astype(jnp.bfloat16)

        x_in = xb_ref[...]
    else:
        x_in = x_ref[...]          # already bf16 (cast in the wrapper)

    # h_k = act(x @ W1[:, k-tile] + b1[k-tile])       (bf16 MXU, f32 acc)
    h = jnp.dot(x_in, w1_ref[...],
                preferred_element_type=jnp.float32) + b1_ref[...]
    h = _activate(h, act)

    # TODO(synk): dropout with p > 0 would need pltpu.prng_seed /
    # pltpu.prng_random_bits; the module default (p = 0.0) is an identity.

    # partial = h_k @ W2[k-tile, j-tile]               (bf16 MXU, f32 acc)
    part = jnp.dot(h.astype(jnp.bfloat16), w2_ref[...],
                   preferred_element_type=jnp.float32)

    if multi_k:
        @pl.when(k == 0)
        def _():
            acc_ref[...] = jnp.zeros_like(acc_ref)

        acc_ref[...] += part

        @pl.when(k == pl.num_programs(2) - 1)
        def _():
            y = acc_ref[...] + b2_ref[...]
            o_ref[...] = _activate(y, act).astype(o_ref.dtype)
    else:
        # Single reduction block: no accumulator scratch needed.
        y = part + b2_ref[...]
        o_ref[...] = _activate(y, act).astype(o_ref.dtype)


def mlp_pallas(x, params, *, normalize=False, ln_eps=1e-5, act="relu",
               block_m=256, block_n=256, block_k=512,
               vmem_limit_bytes=None):
    """x: (M, d_in) float32.  params: dict of f32 parameters in kernel layout."""
    M, d_in = x.shape
    w1 = params["w1"]          # (d_in, d_hid)
    b1 = params["b1"]          # (1, d_hid)
    w2 = params["w2"]          # (d_hid, d_out)
    b2 = params["b2"]          # (1, d_out)
    d_hid = w1.shape[1]
    d_out = w2.shape[1]

    # ---- tile sizes and padded (lane-dense, tile-divisible) dimensions ------
    bm = max(8, min(block_m, _round_up(M, 128)))
    mp = _round_up(M, bm)

    hp = _round_up(d_hid, 128)
    bk = hp if hp <= block_k else block_k
    hp = _round_up(hp, bk)

    op = _round_up(d_out, 128)
    bn = op if op <= block_n else block_n
    op = _round_up(op, bn)

    grid = (mp // bm, op // bn, hp // bk)
    multi_k = grid[2] > 1

    # ---- zero-pad operands; padded cols/rows stay zero so results are exact -
    xp = jnp.pad(x, ((0, mp - M), (0, 0)))
    if not normalize:
        # No LN -> feed the MXU directly; halve x DMA traffic.
        xp = xp.astype(jnp.bfloat16)
    w1p = jnp.pad(w1, ((0, 0), (0, hp - d_hid))).astype(jnp.bfloat16)
    b1p = jnp.pad(b1, ((0, 0), (0, hp - d_hid)))
    w2p = jnp.pad(w2, ((0, hp - d_hid), (0, op - d_out))).astype(jnp.bfloat16)
    b2p = jnp.pad(b2, ((0, 0), (0, op - d_out)))

    x_spec = pl.BlockSpec((bm, d_in), lambda i, j, k: (i, 0))
    w1_spec = pl.BlockSpec((d_in, bk), lambda i, j, k: (0, k))
    b1_spec = pl.BlockSpec((1, bk), lambda i, j, k: (0, k))
    w2_spec = pl.BlockSpec((bk, bn), lambda i, j, k: (k, j))
    b2_spec = pl.BlockSpec((1, bn), lambda i, j, k: (0, j))
    out_spec = pl.BlockSpec((bm, bn), lambda i, j, k: (i, j))

    args = [xp]
    in_specs = [x_spec]
    if normalize:
        ln_spec = pl.BlockSpec((1, d_in), lambda i, j, k: (0, 0))
        args += [params["gamma"], params["beta"]]
        in_specs += [ln_spec, ln_spec]
    args += [w1p, b1p, w2p, b2p]
    in_specs += [w1_spec, b1_spec, w2_spec, b2_spec]

    scratch_shapes = []
    if normalize:
        scratch_shapes.append(pltpu.VMEM((bm, d_in), jnp.bfloat16))  # LN'd x
    if multi_k:
        scratch_shapes.append(pltpu.VMEM((bm, bn), jnp.float32))     # f32 acc

    flops = 2 * mp * (d_in * hp + hp * op)
    transcendentals = mp if normalize else 0
    bytes_accessed = int(xp.size * xp.dtype.itemsize
                         + w1p.size * 2 + w2p.size * 2
                         + b1p.size * 4 + b2p.size * 4 + mp * op * 4)
    cost = pl.CostEstimate(flops=flops, transcendentals=transcendentals,
                           bytes_accessed=bytes_accessed)

    kernel = functools.partial(_mlp_kernel, normalize=normalize,
                               ln_eps=ln_eps, multi_k=multi_k, act=act)

    out = pl.pallas_call(
        kernel,
        out_shape=jax.ShapeDtypeStruct((mp, op), x.dtype),
        grid_spec=pltpu.PrefetchScalarGridSpec(
            num_scalar_prefetch=0,
            grid=grid,
            in_specs=in_specs,
            out_specs=out_spec,
            scratch_shapes=scratch_shapes),
        compiler_params=pltpu.CompilerParams(
            dimension_semantics=("parallel", "parallel", "arbitrary"),
            vmem_limit_bytes=vmem_limit_bytes),
        cost_estimate=cost,
    )(*args)

    return out[:M, :d_out]


def init_params(key, d_in, d_hid, d_out):
    """Deterministic synthetic params in the kernel's layout.

    PyTorch stores Linear weight as (d_out, d_in); generate in that shape then
    transpose to (d_in, d_out) for the kernel's row-major matmul.
    """
    k1, k2, k3, k4 = jax.random.split(key, 4)
    w1_pt = jax.random.normal(k1, (d_hid, d_in), jnp.float32) * 0.1
    b1_pt = jax.random.normal(k2, (d_hid,), jnp.float32) * 0.1
    w2_pt = jax.random.normal(k3, (d_out, d_hid), jnp.float32) * 0.1
    b2_pt = jax.random.normal(k4, (d_out,), jnp.float32) * 0.1
    return {
        "w1": w1_pt.T,                       # (d_in, d_hid)
        "b1": b1_pt.reshape(1, d_hid),
        "w2": w2_pt.T,                       # (d_hid, d_out)
        "b2": b2_pt.reshape(1, d_out),
        "gamma": jnp.ones((1, d_in), jnp.float32),   # nn.LayerNorm init
        "beta": jnp.zeros((1, d_in), jnp.float32),
    }


def mlp_reference(x, params, *, normalize=False, ln_eps=1e-5, act="relu"):
    """Pure-JAX f32 reference mirroring the PyTorch forward exactly."""
    if normalize:
        mu = jnp.mean(x, axis=-1, keepdims=True)
        var = jnp.mean((x - mu) ** 2, axis=-1, keepdims=True)
        x = (x - mu) / jnp.sqrt(var + ln_eps)
        x = x * params["gamma"] + params["beta"]
    h = _activate(x @ params["w1"] + params["b1"], act)
    y = _activate(h @ params["w2"] + params["b2"], act)
    return y


if __name__ == "__main__":
    ok = True
    # bf16 matmul inputs with f32 accumulation vs f32 reference -> ~0.5% rel err.
    ATOL = RTOL = 3e-2

    key = jax.random.PRNGKey(0)
    kx, kp, kx2, kp2 = jax.random.split(key, 4)

    # Case 1: toy shapes that exercise padding (d_hid=64, d_out=16 -> 128
    # lanes, M=16 -> padded to one 128-row tile) and the single-k fast path.
    M, d_in, d_hid, d_out = 16, 32, 64, 16
    x = jax.random.normal(kx, (M, d_in), jnp.float32)
    params = init_params(kp, d_in, d_hid, d_out)
    for normalize in (False, True):
        out = jax.block_until_ready(mlp_pallas(x, params, normalize=normalize))
        ref = mlp_reference(x, params, normalize=normalize)
        ok = ok and (out.shape == ref.shape)
        ok = ok and bool(jnp.allclose(out, ref, atol=ATOL, rtol=RTOL))

    # Case 2: shapes that exercise a multi-tile grid (2 x 2 x 2) with the
    # k-axis f32 accumulator and the cached LN tile.
    M2, d_in2, d_hid2, d_out2 = 256, 32, 256, 256
    x2 = jax.random.normal(kx2, (M2, d_in2), jnp.float32)
    params2 = init_params(kp2, d_in2, d_hid2, d_out2)
    for normalize in (False, True):
        out = jax.block_until_ready(
            mlp_pallas(x2, params2, normalize=normalize,
                       block_m=128, block_n=128, block_k=128))
        ref = mlp_reference(x2, params2, normalize=normalize)
        ok = ok and bool(jnp.allclose(out, ref, atol=ATOL, rtol=RTOL))

    print("KERNEL_OK" if ok else "KERNEL_MISMATCH")
</pallas_src>

<mosaic_0001>
module attributes {stable_mosaic.version = 11 : i64} {
  func.func @_mlp_kernel(%arg0: i32, %arg1: i32, %arg2: i32, %arg3: memref<128x32xbf16, #tpu.memory_space<vmem>>, %arg4: memref<32x128xbf16, #tpu.memory_space<vmem>>, %arg5: memref<1x128xf32, #tpu.memory_space<vmem>>, %arg6: memref<128x128xbf16, #tpu.memory_space<vmem>>, %arg7: memref<1x128xf32, #tpu.memory_space<vmem>>, %arg8: memref<128x128xf32, #tpu.memory_space<vmem>>) attributes {dimension_semantics = [#tpu.dimension_semantics<parallel>, #tpu.dimension_semantics<parallel>, #tpu.dimension_semantics<arbitrary>], iteration_bounds = array<i64: 1, 1, 1>, scalar_prefetch = 0 : i64, scratch_operands = 0 : i64, tpu.core_type = #tpu.core_type<tc>, window_params = [{transform_indices = @transform_0, window_bounds = array<i64: 128, 32>}, {transform_indices = @transform_1, window_bounds = array<i64: 32, 128>}, {transform_indices = @transform_2, window_bounds = array<i64: 1, 128>}, {transform_indices = @transform_3, window_bounds = array<i64: 128, 128>}, {transform_indices = @transform_4, window_bounds = array<i64: 1, 128>}, {transform_indices = @transform_5, window_bounds = array<i64: 128, 128>}]} {
    %c0 = arith.constant 0 : index
    %c0_0 = arith.constant 0 : index
    %0 = vector.load %arg3[%c0, %c0_0] : memref<128x32xbf16, #tpu.memory_space<vmem>>, vector<128x32xbf16>
    %c0_1 = arith.constant 0 : index
    %c0_2 = arith.constant 0 : index
    %1 = vector.load %arg4[%c0_1, %c0_2] : memref<32x128xbf16, #tpu.memory_space<vmem>>, vector<32x128xbf16>
    %cst = arith.constant dense<0.000000e+00> : vector<128x128xf32>
    %2 = tpu.matmul %0, %1, %cst {dimension_numbers = #tpu.dot_dimension_numbers<[1], [0], [0], [1], [0, 0, 1, 1], [], []>} : vector<128x32xbf16>, vector<32x128xbf16>, vector<128x128xf32> -> vector<128x128xf32>
    %c0_3 = arith.constant 0 : index
    %c0_4 = arith.constant 0 : index
    %3 = vector.load %arg5[%c0_3, %c0_4] : memref<1x128xf32, #tpu.memory_space<vmem>>, vector<1x128xf32>
    %4 = vector.broadcast %3 : vector<1x128xf32> to vector<128x128xf32>
    %5 = arith.addf %2, %4 : vector<128x128xf32>
    %cst_5 = arith.constant 0.000000e+00 : f32
    %6 = vector.broadcast %cst_5 : f32 to vector<128x128xf32>
    %7 = arith.maximumf %5, %6 : vector<128x128xf32>
    %8 = arith.truncf %7 : vector<128x128xf32> to vector<128x128xbf16>
    %c0_6 = arith.constant 0 : index
    %c0_7 = arith.constant 0 : index
    %9 = vector.load %arg6[%c0_6, %c0_7] : memref<128x128xbf16, #tpu.memory_space<vmem>>, vector<128x128xbf16>
    %cst_8 = arith.constant dense<0.000000e+00> : vector<128x128xf32>
    %10 = tpu.matmul %8, %9, %cst_8 {dimension_numbers = #tpu.dot_dimension_numbers<[1], [0], [0], [1], [0, 0, 1, 1], [], []>} : vector<128x128xbf16>, vector<128x128xbf16>, vector<128x128xf32> -> vector<128x128xf32>
    %c0_9 = arith.constant 0 : index
    %c0_10 = arith.constant 0 : index
    %11 = vector.load %arg7[%c0_9, %c0_10] : memref<1x128xf32, #tpu.memory_space<vmem>>, vector<1x128xf32>
    %12 = vector.broadcast %11 : vector<1x128xf32> to vector<128x128xf32>
    %13 = arith.addf %10, %12 : vector<128x128xf32>
    %cst_11 = arith.constant 0.000000e+00 : f32
    %14 = vector.broadcast %cst_11 : f32 to vector<128x128xf32>
    %15 = arith.maximumf %13, %14 : vector<128x128xf32>
    %c0_12 = arith.constant 0 : index
    %c0_13 = arith.constant 0 : index
    %16 = vector.load %arg8[%c0_12, %c0_13] : memref<128x128xf32, #tpu.memory_space<vmem>>, vector<128x128xf32>
    tpu.vector_store %arg8[%c0_12, %c0_13], %15 {strides = array<i32>} : memref<128x128xf32, #tpu.memory_space<vmem>>, vector<128x128xf32>,
    return
  }
  func.func @transform_0(%arg0: i32, %arg1: i32, %arg2: i32) -> (i32, i32) {
    %c0_i32 = arith.constant 0 : i32
    %c0_i32_0 = arith.constant 0 : i32
    return %arg0, %c0_i32 : i32, i32
  }
  func.func @transform_1(%arg0: i32, %arg1: i32, %arg2: i32) -> (i32, i32) {
    %c0_i32 = arith.constant 0 : i32
    %c0_i32_0 = arith.constant 0 : i32
    return %c0_i32, %arg2 : i32, i32
  }
  func.func @transform_2(%arg0: i32, %arg1: i32, %arg2: i32) -> (i32, i32) {
    %c0_i32 = arith.constant 0 : i32
    %c0_i32_0 = arith.constant 0 : i32
    return %c0_i32, %arg2 : i32, i32
  }
  func.func @transform_3(%arg0: i32, %arg1: i32, %arg2: i32) -> (i32, i32) {
    %c0_i32 = arith.constant 0 : i32
    return %arg2, %arg1 : i32, i32
  }
  func.func @transform_4(%arg0: i32, %arg1: i32, %arg2: i32) -> (i32, i32) {
    %c0_i32 = arith.constant 0 : i32
    %c0_i32_0 = arith.constant 0 : i32
    return %c0_i32, %arg1 : i32, i32
  }
  func.func @transform_5(%arg0: i32, %arg1: i32, %arg2: i32) -> (i32, i32) {
    %c0_i32 = arith.constant 0 : i32
    return %arg0, %arg1 : i32, i32
  }
}

</mosaic_0001>

<bundles_post_ra>
// kernel: tpu_custom_call.1
= control target key start
LH: loop header
LB: loop body
LE: loop exit
PB: predicated region body
PF: predicated region fallthrough
CT: control target
= control target key end

     0   :  { %vm101_vm0 = vcmask 261120   ;;  %s750_s0 = inlined_call_operand.vmem [shape: bf16[128,32], index: 0, kind: input, shape index: {}]   ;;  %s751_s1 = inlined_call_operand.vmem [shape: bf16[32,128], index: 1, kind: input, shape index: {}]   ;;  %s752_s2 = inlined_call_operand.vmem [shape: f32[1,128], index: 2, kind: input, shape index: {}]   ;;  %s753_s3 = inlined_call_operand.vmem [shape: bf16[128,128], index: 3, kind: input, shape index: {}]   ;;  %s754_s4 = inlined_call_operand.vmem [shape: f32[1,128], index: 4, kind: input, shape index: {}]   ;;  %s755_s5 = inlined_call_operand.hbm [shape: f32[128,128], index: 5, kind: output, shape index: {}]  }
   0x1   :  { %v588_v0 = vld [vmem:[%s751_s1 + $0x8] sm:$0xff]   ;;  %v589_v1 = vld [vmem:[%s751_s1] sm:$0xff]   ;;  %v592_v4 = vld [vmem:[%s750_s0 + $0x10] sm:$0xff]  }
   0x2   :  { %517 = vmatprep.subr.bf16.mxu0 %v588_v0  ;;  %v590_v2 = vld [vmem:[%s750_s0] sm:$0xff]   ;;  %v591_v3 = vld [vmem:[%s750_s0 + $0x8] sm:$0xff]   ;;  %v598_v5 = vld [vmem:[%s753_s3 + $0x38] sm:$0xff]  }
   0x3   :  { %518 = vmatpush3.bf16.msra.mxu0 %v588_v0  ;;  %521 = vmatprep.mubr.msk.bf16.mxu0 %vm101_vm0, %v590_v2  ;;  %v599_v6 = vld [vmem:[%s753_s3 + $0x30] sm:$0xff]   ;;  %v593_v7 = vld [vmem:[%s750_s0 + $0x18] sm:$0xff]   ;;  %v594_v8 = vld [vmem:[%s750_s0 + $0x20] sm:$0xff]  }
   0x4   :  { %519 = vmatprep.subr.bf16.mxu0 %v589_v1  ;;  %569 = vmatprep.subr.bf16.mxu1 %v598_v5  ;;  %v600_v9 = vld [vmem:[%s753_s3 + $0x28] sm:$0xff]  }
   0x5   :  { %577 = vmatpush3.bf16.msra.mxu1 %v598_v5 }
   0x6   :  { %570 = vmatprep.subr.bf16.mxu1 %v599_v6 }
   0x7   :  { %520 = vmatpush3.bf16.msra.mxu0 %v589_v1 }
   0x8   :  { %537 = vmatprep.subr.bf16.mxu0 %v598_v5 }
   0x9   :  { %578 = vmatpush3.bf16.msra.mxu1 %v599_v6 }
   0xa   :  { %522 = vmatmul.mubr.msk.bf16.vlgmr.msra.gmra.mxu0 %vm101_vm0, %v591_v3 }
   0xb   :  { %525 = vmatprep.mubr.msk.bf16.mxu0 %vm101_vm0, %v592_v4  ;;  %538 = vmatpush3.bf16.msra.mxu0 %v598_v5 }
   0xc   :  { %539 = vmatprep.subr.bf16.mxu0 %v599_v6 }
   0xf   :  { %540 = vmatpush3.bf16.msra.mxu0 %v599_v6 }
  0x10   :  { %10 = vsyncpa [#allocation3], 0  ;;  %541 = vmatprep.subr.bf16.mxu0 %v600_v9  ;;  %v601_v10 = vld [vmem:[%s753_s3 + $0x20] sm:$0xff]   ;;  %571 = vmatprep.subr.bf16.mxu1 %v600_v9  ;;  %v595_v11 = vld [vmem:[%s750_s0 + $0x28] sm:$0xff]  }
  0x11   :  { %579 = vmatpush3.bf16.msra.mxu1 %v600_v9  ;;  %v602_v12 = vld [vmem:[%s753_s3 + $0x18] sm:$0xff]   ;;  %v596_v13 = vld [vmem:[%s750_s0 + $0x30] sm:$0xff]   ;;  %v604_v16 = vld [vmem:[%s753_s3 + $0x8] sm:$0xff]  }
  0x12   :  { %526 = vmatmul.mubr.msk.bf16.gmra.mxu0 %vm101_vm0, %v593_v7  ;;  %572 = vmatprep.subr.bf16.mxu1 %v601_v10  ;;  %v597_v14 = vld [vmem:[%s750_s0 + $0x38] sm:$0xff]   ;;  %v603_v15 = vld [vmem:[%s753_s3 + $0x10] sm:$0xff]   ;;  %v605_v17 = vld [vmem:[%s753_s3] sm:$0xff]  }
  0x13   :  { %529 = vmatprep.mubr.msk.bf16.mxu0 %vm101_vm0, %v594_v8  ;;  %542 = vmatpush3.bf16.msra.mxu0 %v600_v9  ;;  %v463_v20 = vld [vmem:[%s752_s2] ss:$0 sm:$0xff] }
  0x14   :  { %543 = vmatprep.subr.bf16.mxu0 %v601_v10 }
  0x15   :  { %580 = vmatpush3.bf16.msra.mxu1 %v601_v10 }
  0x16   :  { %573 = vmatprep.subr.bf16.mxu1 %v602_v12 }
  0x17   :  { %544 = vmatpush3.bf16.msra.mxu0 %v601_v10 }
  0x18   :  { %545 = vmatprep.subr.bf16.mxu0 %v602_v12 }
  0x19   :  { %581 = vmatpush3.bf16.msra.mxu1 %v602_v12 }
  0x1a   :  { %530 = vmatmul.mubr.msk.bf16.gmra.mxu0 %vm101_vm0, %v595_v11  ;;  %574 = vmatprep.subr.bf16.mxu1 %v603_v15  ;;  %v729_v11 = vld [vmem:[%s754_s4] ss:$0 sm:$0xff]  ;;  %s628_s4 = smov [#allocation2]  }
  0x1b   :  { %533 = vmatprep.mubr.msk.bf16.mxu0 %vm101_vm0, %v596_v13  ;;  %546 = vmatpush3.bf16.msra.mxu0 %v602_v12  ;;  %s452_s28 = sshll.u32 %s628_s4, 4  ;;  %s453_s28 = int_to_ptr.vmem [resolvable:$true] %s452_s28 }
  0x1c   :  { %547 = vmatprep.subr.bf16.mxu0 %v603_v15  ;;  %s606_s29 = scalar_lea.vmem %s453_s28, 2048  ;;  %p611_p1 = scmp.lt.s32.totalorder %s453_s28, %s453_s28 }
  0x1d   :  { %582 = vmatpush3.bf16.msra.mxu1 %v603_v15  ;;  %p607_p0 = scmp.ne.s32.totalorder %s453_s28, %s606_s29  ;;  %p612_p2 = scmp.lt.s32.totalorder %s606_s29, %s606_s29 }
  0x1e   :  { %575 = vmatprep.subr.bf16.mxu1 %v604_v16 }
  0x1f   :  { %548 = vmatpush3.bf16.msra.mxu0 %v603_v15  ;;  %p613_p3 = por %p612_p2, %p611_p1 }
  0x20   :  { %549 = vmatprep.subr.bf16.mxu0 %v604_v16 }
  0x21   :  { %583 = vmatpush3.bf16.msra.mxu1 %v604_v16  ;;  %p614_p4 = pnand %p613_p3, %p607_p0 }
  0x22   :  { %534 = vmatmul.mubr.msk.bf16.gmra.mxu0 %vm101_vm0, %v597_v14  ;;  %576 = vmatprep.subr.bf16.mxu1 %v605_v17 }
  0x23   :  { %550 = vmatpush3.bf16.msra.mxu0 %v604_v16 }
  0x24   :  { %551 = vmatprep.subr.bf16.mxu0 %v605_v17 }
  0x25   :  { %584 = vmatpush3.bf16.msra.mxu1 %v605_v17 }
  0x27   :  { %552 = vmatpush3.bf16.msra.mxu0 %v605_v17 }
  0xca   :  { %v523_v18 = vpop.f32.mrf.mxu0 }
  0xcb   :  { %v169_v24 = vadd.f32 %v523_v18, %v463_v20 }
  0xcc   :  { %v160_v19 = vpop.f32.mrf.mxu0 }
  0xcd   :  { %v161_v22 = vadd.f32 %v463_v20, %v160_v19  ;;  %v225_v31 = vmax.f32 %v169_v24, 0.0 }
  0xce   :  { %v524_v21 = vpop.f32.mrf.mxu0 }
  0xcf   :  { %v172_v23 = vadd.f32 %v524_v21, %v463_v20  ;;  %v223_v29 = vmax.f32 %v161_v22, 0.0 }
  0xd0   :  { %v163_v25 = vpop.f32.mrf.mxu0 }
  0xd1   :  { %v164_v26 = vadd.f32 %v463_v20, %v163_v25  ;;  %v226_v27 = vmax.f32 %v172_v23, 0.0 }
  0xd2   :  { %v527_v28 = vpop.f32.mrf.mxu0 }
  0xd3   :  { %v224_v30 = vmax.f32 %v164_v26, 0.0  ;;  %v240_v34 = vpack.c.bf16 %v226_v27, %v225_v31  ;;  %v185_v38 = vadd.f32 %v527_v28, %v463_v20 }
  0xd4   :  { %v176_v32 = vpop.f32.mrf.mxu0 }
  0xd5   :  { %v239_v33 = vpack.c.bf16 %v224_v30, %v223_v29  ;;  %v177_v36 = vadd.f32 %v463_v20, %v176_v32  ;;  %v229_v45 = vmax.f32 %v185_v38, 0.0 }
  0xd6   :  { %v528_v35 = vpop.f32.mrf.mxu0 }
  0xd7   :  { %v188_v37 = vadd.f32 %v528_v35, %v463_v20  ;;  %553 = vmatprep.mubr.bf16.mxu0 %v239_v33  ;;  %v227_v43 = vmax.f32 %v177_v36, 0.0 }
  0xd8   :  { %v179_v39 = vpop.f32.mrf.mxu0  ;;  %554 = vmatmul.mubr.bf16.vlgmr.msra.gmra.mxu0 %v240_v34 }
  0xd9   :  { %v180_v40 = vadd.f32 %v463_v20, %v179_v39  ;;  %v230_v41 = vmax.f32 %v188_v37, 0.0 }
  0xda   :  { %v531_v42 = vpop.f32.mrf.mxu0 }
  0xdb   :  { %v228_v44 = vmax.f32 %v180_v40, 0.0  ;;  %v242_v48 = vpack.c.bf16 %v230_v41, %v229_v45  ;;  %v201_v52 = vadd.f32 %v531_v42, %v463_v20 }
  0xdc   :  { %v192_v46 = vpop.f32.mrf.mxu0 }
  0xdd   :  { %v241_v47 = vpack.c.bf16 %v228_v44, %v227_v43  ;;  %v193_v50 = vadd.f32 %v463_v20, %v192_v46  ;;  %v233_v59 = vmax.f32 %v201_v52, 0.0 }
  0xde   :  { %v532_v49 = vpop.f32.mrf.mxu0 }
  0xdf   :  { %v204_v51 = vadd.f32 %v532_v49, %v463_v20  ;;  %557 = vmatprep.mubr.bf16.mxu1 %v241_v47  ;;  %v231_v57 = vmax.f32 %v193_v50, 0.0 }
  0xe0   :  { %v195_v53 = vpop.f32.mrf.mxu0  ;;  %558 = vmatmul.mubr.bf16.vlgmr.msra.gmra.mxu1 %v242_v48 }
  0xe1   :  { %v196_v54 = vadd.f32 %v463_v20, %v195_v53  ;;  %v234_v55 = vmax.f32 %v204_v51, 0.0 }
  0xe2   :  { %v535_v56 = vpop.f32.mrf.mxu0 }
  0xe3   :  { %v232_v58 = vmax.f32 %v196_v54, 0.0  ;;  %v244_v62 = vpack.c.bf16 %v234_v55, %v233_v59  ;;  %v217_v2 = vadd.f32 %v535_v56, %v463_v20 }
  0xe4   :  { %v208_v60 = vpop.f32.mrf.mxu0 }
  0xe5   :  { %v243_v61 = vpack.c.bf16 %v232_v58, %v231_v57  ;;  %v209_v0 = vadd.f32 %v463_v20, %v208_v60  ;;  %v237_v8 = vmax.f32 %v217_v2, 0.0 }
  0xe6   :  { %v536_v63 = vpop.f32.mrf.mxu0 }
  0xe7   :  { %v220_v1 = vadd.f32 %v536_v63, %v463_v20  ;;  %561 = vmatprep.mubr.bf16.mxu1 %v243_v61  ;;  %v235_v6 = vmax.f32 %v209_v0, 0.0 }
  0xe8   :  { %v211_v3 = vpop.f32.mrf.mxu0  ;;  %562 = vmatmul.mubr.bf16.gmra.mxu1 %v244_v62 }
  0xe9   :  { %v212_v4 = vadd.f32 %v463_v20, %v211_v3  ;;  %v238_v5 = vmax.f32 %v220_v1, 0.0 }
  0xeb   :  { %v236_v7 = vmax.f32 %v212_v4, 0.0  ;;  %v246_v10 = vpack.c.bf16 %v238_v5, %v237_v8 }
  0xed   :  { %v245_v9 = vpack.c.bf16 %v236_v7, %v235_v6 }
  0xef   :  { %565 = vmatprep.mubr.bf16.mxu1 %v245_v9 }
  0xf0   :  { %566 = vmatmul.mubr.bf16.gmra.mxu1 %v246_v10 }
 0x198   :  { %v555_v12 = vpop.f32.mrf.mxu0 }
 0x199   :  { %v361_v13 = vadd.f32 %v555_v12, %v729_v11 }
 0x19a   :  { %v352_v14 = vpop.f32.mrf.mxu0 }
 0x19b   :  { %v417_v15 = vmax.f32 %v361_v13, 0.0  ;;  %v353_v16 = vadd.f32 %v729_v11, %v352_v14 }
 0x19c   :  { %v556_v17 = vpop.f32.mrf.mxu0 }
 0x19d   :  { %433 = vst [vmem:[#allocation2 + $0x10] sm:$0xff] %v417_v15  ;;  %v415_v18 = vmax.f32 %v353_v16, 0.0  ;;  %v364_v19 = vadd.f32 %v556_v17, %v729_v11 }
 0x19e   :  { %v355_v20 = vpop.f32.mrf.mxu0 }
 0x19f   :  { %431 = vst [vmem:[#allocation2] sm:$0xff] %v415_v18  ;;  %v418_v21 = vmax.f32 %v364_v19, 0.0  ;;  %v356_v22 = vadd.f32 %v729_v11, %v355_v20 }
 0x1a0   :  { %v559_v23 = vpop.f32.mrf.mxu1 }
 0x1a1   :  { %434 = vst [vmem:[#allocation2 + $0x18] sm:$0xff] %v418_v21  ;;  %v416_v24 = vmax.f32 %v356_v22, 0.0  ;;  %v377_v25 = vadd.f32 %v559_v23, %v729_v11 }
 0x1a2   :  { %v368_v26 = vpop.f32.mrf.mxu1 }
 0x1a3   :  { %432 = vst [vmem:[#allocation2 + $0x8] sm:$0xff] %v416_v24  ;;  %v421_v27 = vmax.f32 %v377_v25, 0.0  ;;  %v369_v28 = vadd.f32 %v729_v11, %v368_v26 }
 0x1a4   :  { %v560_v29 = vpop.f32.mrf.mxu1 }
 0x1a5   :  { %437 = vst [vmem:[#allocation2 + $0x30] sm:$0xff] %v421_v27  ;;  %v419_v30 = vmax.f32 %v369_v28, 0.0  ;;  %v380_v31 = vadd.f32 %v560_v29, %v729_v11 }
 0x1a6   :  { %v371_v32 = vpop.f32.mrf.mxu1 }
 0x1a7   :  { %435 = vst [vmem:[#allocation2 + $0x20] sm:$0xff] %v419_v30  ;;  %v422_v33 = vmax.f32 %v380_v31, 0.0  ;;  %v372_v34 = vadd.f32 %v729_v11, %v371_v32 }
 0x1a8   :  { %v563_v35 = vpop.f32.mrf.mxu1 }
 0x1a9   :  { %438 = vst [vmem:[#allocation2 + $0x38] sm:$0xff] %v422_v33  ;;  %v420_v36 = vmax.f32 %v372_v34, 0.0  ;;  %v393_v37 = vadd.f32 %v563_v35, %v729_v11 }
 0x1aa   :  { %v384_v38 = vpop.f32.mrf.mxu1 }
 0x1ab   :  { %436 = vst [vmem:[#allocation2 + $0x28] sm:$0xff] %v420_v36  ;;  %v425_v39 = vmax.f32 %v393_v37, 0.0  ;;  %v385_v40 = vadd.f32 %v729_v11, %v384_v38 }
 0x1ac   :  { %v564_v41 = vpop.f32.mrf.mxu1 }
 0x1ad   :  { %441 = vst [vmem:[#allocation2 + $0x50] sm:$0xff] %v425_v39  ;;  %v423_v42 = vmax.f32 %v385_v40, 0.0  ;;  %v396_v43 = vadd.f32 %v564_v41, %v729_v11 }
 0x1ae   :  { %v387_v44 = vpop.f32.mrf.mxu1 }
 0x1af   :  { %439 = vst [vmem:[#allocation2 + $0x40] sm:$0xff] %v423_v42  ;;  %v426_v45 = vmax.f32 %v396_v43, 0.0  ;;  %v388_v46 = vadd.f32 %v729_v11, %v387_v44 }
 0x1b0   :  { %v567_v47 = vpop.f32.mrf.mxu1 }
 0x1b1   :  { %442 = vst [vmem:[#allocation2 + $0x58] sm:$0xff] %v426_v45  ;;  %v424_v48 = vmax.f32 %v388_v46, 0.0  ;;  %v409_v49 = vadd.f32 %v567_v47, %v729_v11 }
 0x1b2   :  { %v400_v50 = vpop.f32.mrf.mxu1 }
 0x1b3   :  { %440 = vst [vmem:[#allocation2 + $0x48] sm:$0xff] %v424_v48  ;;  %v429_v51 = vmax.f32 %v409_v49, 0.0  ;;  %v401_v52 = vadd.f32 %v729_v11, %v400_v50 }
 0x1b4   :  { %v568_v53 = vpop.f32.mrf.mxu1 }
 0x1b5   :  { %445 = vst [vmem:[#allocation2 + $0x70] sm:$0xff] %v429_v51  ;;  %v427_v54 = vmax.f32 %v401_v52, 0.0  ;;  %v412_v55 = vadd.f32 %v568_v53, %v729_v11 }
 0x1b6   :  { %v403_v56 = vpop.f32.mrf.mxu1 }
 0x1b7   :  { %443 = vst [vmem:[#allocation2 + $0x60] sm:$0xff] %v427_v54  ;;  %v430_v57 = vmax.f32 %v412_v55, 0.0  ;;  %v404_v58 = vadd.f32 %v729_v11, %v403_v56 }
 0x1b9   :  { %446 = vst [vmem:[#allocation2 + $0x78] sm:$0xff] %v430_v57  ;;  %v428_v59 = vmax.f32 %v404_v58, 0.0 }
 0x1bb   :  { %444 = vst [vmem:[#allocation2 + $0x68] sm:$0xff] %v428_v59 }
 0x1bc   :  { %617 = shalt.err (!%p614_p4)
}
 0x1bd   :  { %s629_s30 = smov 128   ;;  %s630_s6 = smov 8  }
 0x1be   :  { %458 = dma.vmem_to_hbm [thread:$0]  %s453_s28, 2048, %s755_s5, [#allocation3], %s629_s30, %s629_s30, %s630_s6  }
 0x1bf   :  { %626 = dma.done.wait [#allocation3], 2048  }
 0x1c0   :  { %627 = vsyncadd [#allocation3], 4294965248 }
 0x1c1   :  { %462 = vsyncpa [#allocation3], 1 }

</bundles_post_ra>
